<compile_context>
chip_gen: v6e
topology: v6e:2x2x1
jax: 0.10.0
libtpu: 0.0.40
codegen_flags: <defaults>
</compile_context>

<pallas_src>
import math

import jax
import jax.numpy as jnp
from jax.experimental import pallas as pl
from jax.experimental.pallas import tpu as pltpu


def _round_up(n, m):
    return ((n + m - 1) // m) * m


# ---------------------------------------------------------------------------
# Kernel
# ---------------------------------------------------------------------------

def _decoder_kernel(x_ref, w1_ref, b1_ref, w2_ref, b2_ref,
                    wa_ref, ba_ref, wb_ref, bb_ref, o_ref):
    """Fused trunk + all-heads forward for one batch tile.

    NOTE: remainder batch tiles (B % tB != 0) run relu/matmul on padded
    garbage rows; rows are independent and out-of-range writes are dropped,
    so this is benign -- do not "fix" it with masking (it would only add cost).
    """
    compute_dtype = w1_ref.dtype

    # Shared trunk (dropout is identity at inference, so omitted).
    x = x_ref[...]
    h = jnp.dot(x, w1_ref[...], preferred_element_type=jnp.float32)
    h = jnp.maximum(h + b1_ref[...], 0.0).astype(compute_dtype)
    h = jnp.dot(h, w2_ref[...], preferred_element_type=jnp.float32)
    h = jnp.maximum(h + b2_ref[...], 0.0).astype(compute_dtype)

    # All horizons fused: one (half -> padded num_heads*64) matmul + ReLU,
    # then one block-diagonal (padded num_heads*64 -> num_heads*out) matmul.
    # Padded columns of Wa_all/ba_all are zero -> relu(0)=0 -> padded rows of
    # Wb_all are zero -> padding contributes nothing.
    t = jnp.dot(h, wa_ref[...], preferred_element_type=jnp.float32)
    t = jnp.maximum(t + ba_ref[...], 0.0).astype(compute_dtype)
    o = jnp.dot(t, wb_ref[...], preferred_element_type=jnp.float32)
    o_ref[...] = (o + bb_ref[...]).astype(o_ref.dtype)


# ---------------------------------------------------------------------------
# VMEM budgeting / batch tiling
# ---------------------------------------------------------------------------

def _vmem_limits():
    """Returns (scoped vmem_limit_bytes to request, budget for tile chooser)."""
    phys = 64 * 1024 * 1024          # conservative fallback = v7x per-core VMEM
    try:
        info = pltpu.get_tpu_info()
        phys = int(getattr(info, "vmem_capacity_bytes", phys))
    except Exception:
        pass
    limit = min(phys // 2, 64 * 1024 * 1024)   # ~32 MiB on v7x, 64 MiB v5e/v6e
    budget = (limit * 3) // 4                  # headroom for compiler scratch
    return limit, budget


def _choose_tile_b(B, input_dim, x_bytes, hidden_dim, half_dim,
                   fused_head_dim, fused_out_dim, params_bytes, budget):
    """Largest batch tile (multiple of 8, <= 1024) whose full VMEM footprint
    fits the budget. Footprint per row counts: double-buffered x window,
    double-buffered output window and the f32 intermediates; resident params
    are counted with their default 2x buffering. Guarantees >= 2 grid steps
    when B >= 16 so the parallel axis can shard across v7x's 2 TensorCores."""
    per_row = (2 * input_dim * x_bytes                      # x double buffer
               + 2 * fused_out_dim * 4                      # out double buffer
               + (hidden_dim + half_dim + fused_head_dim + fused_out_dim) * 4)
    avail = max(budget - 2 * params_bytes, per_row * 8)
    cap = int(min(max(avail // per_row, 8), 1024))
    if B <= 8:
        return B                       # full-dim exception to the (8,128) rule
    if B <= cap:
        if B >= 16:
            # Split into >=2 tiles (negligible ~0.35us/step cost on v5e/v6e,
            # enables dual-TensorCore execution on v7x).
            return min(B, max(8, _round_up(-(-B // 2), 8)))
        return B
    return max(8, (cap // 8) * 8)


# ---------------------------------------------------------------------------
# Head fusion
# ---------------------------------------------------------------------------

def _fuse_heads(head_params, compute_dtype):
    """Concatenate Wa/ba across heads and build block-diagonal Wb / concat bb."""
    num_heads = len(head_params)
    half_dim, head_hidden = head_params[0][0].shape
    output_dim = head_params[0][2].shape[1]
    fused_hidden = _round_up(num_heads * head_hidden, 128)   # whole MXU tiles
    fused_out = num_heads * output_dim

    wa_all = jnp.zeros((half_dim, fused_hidden), jnp.float32)
    ba_all = jnp.zeros((1, fused_hidden), jnp.float32)
    wb_all = jnp.zeros((fused_hidden, fused_out), jnp.float32)
    bb_all = jnp.zeros((1, fused_out), jnp.float32)
    for i, (wa, ba, wb, bb) in enumerate(head_params):
        r0 = i * head_hidden
        c0 = i * output_dim
        wa_all = wa_all.at[:, r0:r0 + head_hidden].set(wa.astype(jnp.float32))
        ba_all = ba_all.at[:, r0:r0 + head_hidden].set(
            ba.reshape(1, -1).astype(jnp.float32))
        wb_all = wb_all.at[r0:r0 + head_hidden, c0:c0 + output_dim].set(
            wb.astype(jnp.float32))
        bb_all = bb_all.at[:, c0:c0 + output_dim].set(
            bb.reshape(1, -1).astype(jnp.float32))
    return (wa_all.astype(compute_dtype), ba_all,
            wb_all.astype(compute_dtype), bb_all,
            fused_hidden, fused_out, output_dim)


# ---------------------------------------------------------------------------
# Forward wrapper
# ---------------------------------------------------------------------------

def temporal_behavior_decoder_forward(x, params):
    """x: (B, input_dim). Returns {'horizon_k': (B, output_dim)} predictions."""
    B, input_dim = x.shape
    w1, b1, w2, b2 = params["shared"]
    head_names = list(params["heads"].keys())
    head_params = [params["heads"][n] for n in head_names]
    hidden_dim = w1.shape[1]
    half_dim = w2.shape[1]

    # bf16 activations/weights go straight to the MXU (f32 accumulation);
    # anything else computes in f32. Biases always stay f32.
    compute_dtype = jnp.bfloat16 if x.dtype == jnp.bfloat16 else jnp.float32
    x = x.astype(compute_dtype)

    (wa_all, ba_all, wb_all, bb_all,
     fused_hidden, fused_out, output_dim) = _fuse_heads(head_params,
                                                        compute_dtype)

    flat_params = [
        w1.astype(compute_dtype), b1.reshape(1, -1).astype(jnp.float32),
        w2.astype(compute_dtype), b2.reshape(1, -1).astype(jnp.float32),
        wa_all, ba_all, wb_all, bb_all,
    ]
    params_bytes = sum(int(p.size) * p.dtype.itemsize for p in flat_params)

    vmem_limit, vmem_budget = _vmem_limits()
    tB = _choose_tile_b(B, input_dim, x.dtype.itemsize, hidden_dim, half_dim,
                        fused_hidden, fused_out, params_bytes, vmem_budget)
    grid = (pl.cdiv(B, tB),)

    # x / out stream per batch tile; weights & biases use a constant block
    # index so they stay resident in VMEM across all grid steps (no re-DMA).
    x_spec = pl.BlockSpec((tB, input_dim), lambda i: (i, 0))
    param_specs = [pl.BlockSpec(p.shape, lambda i: (0, 0)) for p in flat_params]
    out_spec = pl.BlockSpec((tB, fused_out), lambda i: (i, 0))
    out_shape = jax.ShapeDtypeStruct((B, fused_out), jnp.float32)

    flops = 2 * B * (input_dim * hidden_dim + hidden_dim * half_dim
                     + half_dim * fused_hidden + fused_hidden * fused_out)
    bytes_accessed = (int(x.size) * x.dtype.itemsize + params_bytes
                      + B * fused_out * 4)

    fused = pl.pallas_call(
        _decoder_kernel,
        out_shape=out_shape,
        grid=grid,
        in_specs=[x_spec] + param_specs,
        out_specs=out_spec,
        compiler_params=pltpu.CompilerParams(
            dimension_semantics=("parallel",),
            vmem_limit_bytes=int(vmem_limit)),
        cost_estimate=pl.CostEstimate(
            flops=int(flops), transcendentals=0,
            bytes_accessed=int(bytes_accessed)),
    )(x, *flat_params)

    # Split the single lane-dense fused output back into the per-horizon dict.
    return {name: fused[:, i * output_dim:(i + 1) * output_dim]
            for i, name in enumerate(head_names)}


# ---------------------------------------------------------------------------
# Parameter init (matches PyTorch xavier_uniform_ weights / zero biases) and
# a pure-JAX reference for correctness checking.
# ---------------------------------------------------------------------------

def _xavier_uniform(key, fan_in, fan_out, dtype=jnp.float32):
    # nn.init.xavier_uniform_ (gain=1); stored as (in, out) i.e. W.T
    bound = math.sqrt(6.0 / (fan_in + fan_out))
    return jax.random.uniform(key, (fan_in, fan_out), dtype,
                              minval=-bound, maxval=bound)


def init_temporal_behavior_decoder_params(key, input_dim, output_dim=4,
                                          prediction_horizons=(1, 5, 10),
                                          hidden_dim=128):
    num_heads = len(prediction_horizons)
    keys = jax.random.split(key, 2 + 2 * num_heads)
    w1 = _xavier_uniform(keys[0], input_dim, hidden_dim)
    b1 = jnp.zeros((1, hidden_dim), jnp.float32)
    w2 = _xavier_uniform(keys[1], hidden_dim, hidden_dim // 2)
    b2 = jnp.zeros((1, hidden_dim // 2), jnp.float32)

    heads = {}
    for i, h in enumerate(prediction_horizons):
        wa = _xavier_uniform(keys[2 + 2 * i], hidden_dim // 2, 64)
        ba = jnp.zeros((1, 64), jnp.float32)
        wb = _xavier_uniform(keys[3 + 2 * i], 64, output_dim)
        bb = jnp.zeros((1, output_dim), jnp.float32)
        heads[f"horizon_{h}"] = (wa, ba, wb, bb)

    return {"shared": (w1, b1, w2, b2), "heads": heads}


def temporal_behavior_decoder_reference(x, params):
    """Pure-JAX reference matching the PyTorch forward (eval mode)."""
    w1, b1, w2, b2 = params["shared"]
    h = jax.nn.relu(x @ w1 + b1)
    h = jax.nn.relu(h @ w2 + b2)
    preds = {}
    for name, (wa, ba, wb, bb) in params["heads"].items():
        t = jax.nn.relu(h @ wa + ba)
        preds[name] = t @ wb + bb
    return preds


if __name__ == "__main__":
    # Small shapes consistent with the module's forward: x is (B, input_dim).
    B, input_dim = 2, 32
    output_dim, hidden_dim = 4, 128
    prediction_horizons = (1, 5, 10)

    key = jax.random.PRNGKey(0)
    kx, kp = jax.random.split(key)
    x = jax.random.normal(kx, (B, input_dim), dtype=jnp.float32)
    params = init_temporal_behavior_decoder_params(
        kp, input_dim, output_dim, prediction_horizons, hidden_dim)

    preds = temporal_behavior_decoder_forward(x, params)
    preds = jax.block_until_ready(preds)

    ref = temporal_behavior_decoder_reference(x, params)
    for h in prediction_horizons:
        name = f"horizon_{h}"
        out = preds[name]
        assert out.shape == (B, output_dim), (name, out.shape)
        err = float(jnp.max(jnp.abs(out - ref[name])))
        # f32 path here; if bf16 inputs/weights are used upstream the expected
        # tolerance is looser (precision behavior, not a bug).
        assert jnp.allclose(out, ref[name], atol=1e-4, rtol=1e-4), (
            f"{name}: max abs err {err}")

    # NOTE: nn.Dropout is identity in eval/inference mode, so it is omitted.
    print("KERNEL_OK")
</pallas_src>

<mosaic_0001>
module attributes {stable_mosaic.version = 11 : i64} {
  func.func @_decoder_kernel(%arg0: i32, %arg1: memref<2x32xf32, #tpu.memory_space<vmem>>, %arg2: memref<32x128xf32, #tpu.memory_space<vmem>>, %arg3: memref<1x128xf32, #tpu.memory_space<vmem>>, %arg4: memref<128x64xf32, #tpu.memory_space<vmem>>, %arg5: memref<1x64xf32, #tpu.memory_space<vmem>>, %arg6: memref<64x256xf32, #tpu.memory_space<vmem>>, %arg7: memref<1x256xf32, #tpu.memory_space<vmem>>, %arg8: memref<256x12xf32, #tpu.memory_space<vmem>>, %arg9: memref<1x12xf32, #tpu.memory_space<vmem>>, %arg10: memref<2x12xf32, #tpu.memory_space<vmem>>) attributes {dimension_semantics = [#tpu.dimension_semantics<parallel>], iteration_bounds = array<i64: 1>, scalar_prefetch = 0 : i64, scratch_operands = 0 : i64, tpu.core_type = #tpu.core_type<tc>, window_params = [{transform_indices = @transform_0, window_bounds = array<i64: 2, 32>}, {pipeline_mode = #tpu.pipeline_mode<synchronous>, transform_indices = @transform_1, window_bounds = array<i64: 32, 128>}, {pipeline_mode = #tpu.pipeline_mode<synchronous>, transform_indices = @transform_2, window_bounds = array<i64: 1, 128>}, {pipeline_mode = #tpu.pipeline_mode<synchronous>, transform_indices = @transform_3, window_bounds = array<i64: 128, 64>}, {pipeline_mode = #tpu.pipeline_mode<synchronous>, transform_indices = @transform_4, window_bounds = array<i64: 1, 64>}, {pipeline_mode = #tpu.pipeline_mode<synchronous>, transform_indices = @transform_5, window_bounds = array<i64: 64, 256>}, {pipeline_mode = #tpu.pipeline_mode<synchronous>, transform_indices = @transform_6, window_bounds = array<i64: 1, 256>}, {pipeline_mode = #tpu.pipeline_mode<synchronous>, transform_indices = @transform_7, window_bounds = array<i64: 256, 12>}, {pipeline_mode = #tpu.pipeline_mode<synchronous>, transform_indices = @transform_8, window_bounds = array<i64: 1, 12>}, {transform_indices = @transform_9, window_bounds = array<i64: 2, 12>}]} {
    %c0 = arith.constant 0 : index
    %c0_0 = arith.constant 0 : index
    %0 = vector.load %arg1[%c0, %c0_0] : memref<2x32xf32, #tpu.memory_space<vmem>>, vector<2x32xf32>
    %c0_1 = arith.constant 0 : index
    %c0_2 = arith.constant 0 : index
    %1 = vector.load %arg2[%c0_1, %c0_2] : memref<32x128xf32, #tpu.memory_space<vmem>>, vector<32x128xf32>
    %cst = arith.constant dense<0.000000e+00> : vector<2x128xf32>
    %2 = tpu.matmul %0, %1, %cst {dimension_numbers = #tpu.dot_dimension_numbers<[1], [0], [0], [1], [0, 0, 1, 1], [], []>} : vector<2x32xf32>, vector<32x128xf32>, vector<2x128xf32> -> vector<2x128xf32>
    %c0_3 = arith.constant 0 : index
    %c0_4 = arith.constant 0 : index
    %3 = vector.load %arg3[%c0_3, %c0_4] : memref<1x128xf32, #tpu.memory_space<vmem>>, vector<1x128xf32>
    %4 = vector.broadcast %3 : vector<1x128xf32> to vector<2x128xf32>
    %5 = arith.addf %2, %4 : vector<2x128xf32>
    %cst_5 = arith.constant 0.000000e+00 : f32
    %6 = vector.broadcast %cst_5 : f32 to vector<2x128xf32>
    %7 = arith.maximumf %5, %6 : vector<2x128xf32>
    %c0_6 = arith.constant 0 : index
    %c0_7 = arith.constant 0 : index
    %8 = vector.load %arg4[%c0_6, %c0_7] : memref<128x64xf32, #tpu.memory_space<vmem>>, vector<128x64xf32>
    %cst_8 = arith.constant dense<0.000000e+00> : vector<2x64xf32>
    %9 = tpu.matmul %7, %8, %cst_8 {dimension_numbers = #tpu.dot_dimension_numbers<[1], [0], [0], [1], [0, 0, 1, 1], [], []>} : vector<2x128xf32>, vector<128x64xf32>, vector<2x64xf32> -> vector<2x64xf32>
    %c0_9 = arith.constant 0 : index
    %c0_10 = arith.constant 0 : index
    %10 = vector.load %arg5[%c0_9, %c0_10] : memref<1x64xf32, #tpu.memory_space<vmem>>, vector<1x64xf32>
    %11 = vector.broadcast %10 : vector<1x64xf32> to vector<2x64xf32>
    %12 = arith.addf %9, %11 : vector<2x64xf32>
    %cst_11 = arith.constant 0.000000e+00 : f32
    %13 = vector.broadcast %cst_11 : f32 to vector<2x64xf32>
    %14 = arith.maximumf %12, %13 : vector<2x64xf32>
    %c0_12 = arith.constant 0 : index
    %c0_13 = arith.constant 0 : index
    %15 = vector.load %arg6[%c0_12, %c0_13] : memref<64x256xf32, #tpu.memory_space<vmem>>, vector<64x256xf32>
    %cst_14 = arith.constant dense<0.000000e+00> : vector<2x256xf32>
    %16 = tpu.matmul %14, %15, %cst_14 {dimension_numbers = #tpu.dot_dimension_numbers<[1], [0], [0], [1], [0, 0, 1, 1], [], []>} : vector<2x64xf32>, vector<64x256xf32>, vector<2x256xf32> -> vector<2x256xf32>
    %c0_15 = arith.constant 0 : index
    %c0_16 = arith.constant 0 : index
    %17 = vector.load %arg7[%c0_15, %c0_16] : memref<1x256xf32, #tpu.memory_space<vmem>>, vector<1x256xf32>
    %18 = vector.broadcast %17 : vector<1x256xf32> to vector<2x256xf32>
    %19 = arith.addf %16, %18 : vector<2x256xf32>
    %cst_17 = arith.constant 0.000000e+00 : f32
    %20 = vector.broadcast %cst_17 : f32 to vector<2x256xf32>
    %21 = arith.maximumf %19, %20 : vector<2x256xf32>
    %c0_18 = arith.constant 0 : index
    %c0_19 = arith.constant 0 : index
    %22 = vector.load %arg8[%c0_18, %c0_19] : memref<256x12xf32, #tpu.memory_space<vmem>>, vector<256x12xf32>
    %cst_20 = arith.constant dense<0.000000e+00> : vector<2x12xf32>
    %23 = tpu.matmul %21, %22, %cst_20 {dimension_numbers = #tpu.dot_dimension_numbers<[1], [0], [0], [1], [0, 0, 1, 1], [], []>} : vector<2x256xf32>, vector<256x12xf32>, vector<2x12xf32> -> vector<2x12xf32>
    %c0_21 = arith.constant 0 : index
    %c0_22 = arith.constant 0 : index
    %24 = vector.load %arg9[%c0_21, %c0_22] : memref<1x12xf32, #tpu.memory_space<vmem>>, vector<1x12xf32>
    %25 = vector.broadcast %24 : vector<1x12xf32> to vector<2x12xf32>
    %26 = arith.addf %23, %25 : vector<2x12xf32>
    %c0_23 = arith.constant 0 : index
    %c0_24 = arith.constant 0 : index
    %27 = vector.load %arg10[%c0_23, %c0_24] : memref<2x12xf32, #tpu.memory_space<vmem>>, vector<2x12xf32>
    tpu.vector_store %arg10[%c0_23, %c0_24], %26 {strides = array<i32>} : memref<2x12xf32, #tpu.memory_space<vmem>>, vector<2x12xf32>,
    return
  }
  func.func @transform_0(%arg0: i32) -> (i32, i32) {
    %c0_i32 = arith.constant 0 : i32
    %c0_i32_0 = arith.constant 0 : i32
    return %arg0, %c0_i32 : i32, i32
  }
  func.func @transform_1(%arg0: i32) -> (i32, i32) {
    %c0_i32 = arith.constant 0 : i32
    %c0_i32_0 = arith.constant 0 : i32
    %c0_i32_1 = arith.constant 0 : i32
    return %c0_i32, %c0_i32_0 : i32, i32
  }
  func.func @transform_2(%arg0: i32) -> (i32, i32) {
    %c0_i32 = arith.constant 0 : i32
    %c0_i32_0 = arith.constant 0 : i32
    %c0_i32_1 = arith.constant 0 : i32
    return %c0_i32, %c0_i32_0 : i32, i32
  }
  func.func @transform_3(%arg0: i32) -> (i32, i32) {
    %c0_i32 = arith.constant 0 : i32
    %c0_i32_0 = arith.constant 0 : i32
    %c0_i32_1 = arith.constant 0 : i32
    return %c0_i32, %c0_i32_0 : i32, i32
  }
  func.func @transform_4(%arg0: i32) -> (i32, i32) {
    %c0_i32 = arith.constant 0 : i32
    %c0_i32_0 = arith.constant 0 : i32
    %c0_i32_1 = arith.constant 0 : i32
    return %c0_i32, %c0_i32_0 : i32, i32
  }
  func.func @transform_5(%arg0: i32) -> (i32, i32) {
    %c0_i32 = arith.constant 0 : i32
    %c0_i32_0 = arith.constant 0 : i32
    %c0_i32_1 = arith.constant 0 : i32
    return %c0_i32, %c0_i32_0 : i32, i32
  }
  func.func @transform_6(%arg0: i32) -> (i32, i32) {
    %c0_i32 = arith.constant 0 : i32
    %c0_i32_0 = arith.constant 0 : i32
    %c0_i32_1 = arith.constant 0 : i32
    return %c0_i32, %c0_i32_0 : i32, i32
  }
  func.func @transform_7(%arg0: i32) -> (i32, i32) {
    %c0_i32 = arith.constant 0 : i32
    %c0_i32_0 = arith.constant 0 : i32
    %c0_i32_1 = arith.constant 0 : i32
    return %c0_i32, %c0_i32_0 : i32, i32
  }
  func.func @transform_8(%arg0: i32) -> (i32, i32) {
    %c0_i32 = arith.constant 0 : i32
    %c0_i32_0 = arith.constant 0 : i32
    %c0_i32_1 = arith.constant 0 : i32
    return %c0_i32, %c0_i32_0 : i32, i32
  }
  func.func @transform_9(%arg0: i32) -> (i32, i32) {
    %c0_i32 = arith.constant 0 : i32
    %c0_i32_0 = arith.constant 0 : i32
    return %arg0, %c0_i32 : i32, i32
  }
}

</mosaic_0001>

<bundles_post_ra>
// kernel: tpu_custom_call.1
= control target key start
LH: loop header
LB: loop body
LE: loop exit
PB: predicated region body
PF: predicated region fallthrough
CT: control target
= control target key end

     0   :  { %v577_v1 = vmov 0.0   ;;  %vm578_vm0 = vmmov 0   ;;  %vm45_vm1 = vcmask 261120   ;;  %s877_s0 = inlined_call_operand.vmem [shape: f32[2,32], index: 0, kind: input, shape index: {}]   ;;  %s878_s1 = inlined_call_operand.vmem [shape: f32[32,128], index: 1, kind: input, shape index: {}]   ;;  %s879_s2 = inlined_call_operand.vmem [shape: f32[1,128], index: 2, kind: input, shape index: {}]   ;;  %s880_s3 = inlined_call_operand.vmem [shape: f32[128,64], index: 3, kind: input, shape index: {}]   ;;  %s881_s4 = inlined_call_operand.vmem [shape: f32[1,64], index: 4, kind: input, shape index: {}]   ;;  %s882_s5 = inlined_call_operand.vmem [shape: f32[64,256], index: 5, kind: input, shape index: {}]   ;;  %s883_s6 = inlined_call_operand.vmem [shape: f32[1,256], index: 6, kind: input, shape index: {}]   ;;  %s884_s7 = inlined_call_operand.vmem [shape: f32[256,12], index: 7, kind: input, shape index: {}]   ;;  %s885_s8 = inlined_call_operand.vmem [shape: f32[1,12], index: 8, kind: input, shape index: {}]   ;;  %s886_s9 = inlined_call_operand.hbm [shape: f32[2,12], index: 9, kind: output, shape index: {}]  }
   0x1   :  { %v37_v0 = vld [vmem:[%s878_s1 + $0x18] sm:$0xff]  ;;  %506 = vmatprep.subr.mxu1 %v577_v1  ;;  %v36_v2 = vld [vmem:[%s878_s1 + $0x10] sm:$0xff]  ;;  %514 = vmatprep.mubr.msk.f32.mxu1 %vm578_vm0, %v577_v1  ;;  %v35_v3 = vld [vmem:[%s878_s1 + $0x8] sm:$0xff] }
   0x2   :  { %507 = vmatpush3.msra.mxu1 %v37_v0  ;;  %310 = vmatprep.mubr.f32.mxu0 %v577_v1  ;;  %v34_v4 = vld [vmem:[%s878_s1] sm:$0xff] }
   0x3   :  { %508 = vmatprep.subr.mxu1 %v577_v1  ;;  %v33_v5 = vld [vmem:[%s877_s0] sm:$0x3] }
   0x4   :  { %509 = vmatpush3.msra.mxu1 %v36_v2 }
   0x5   :  { %510 = vmatprep.subr.mxu1 %v577_v1 }
   0x6   :  { %511 = vmatpush3.msra.mxu1 %v35_v3 }
   0x7   :  { %14 = vsyncpa [#allocation3], 0  ;;  %512 = vmatprep.subr.mxu1 %v577_v1  ;;  %v135_v6 = vld [vmem:[%s880_s3 + $0x78] sm:$0xff]  ;;  %v134_v7 = vld [vmem:[%s880_s3 + $0x70] sm:$0xff]  ;;  %vm242_vm2 = vcmask 523264   ;;  %s579_s24 = smov [#allocation2]  }
   0x8   :  { %513 = vmatpush3.msra.mxu1 %v34_v4  ;;  %v133_v8 = vld [vmem:[%s880_s3 + $0x68] sm:$0xff]  ;;  %v132_v9 = vld [vmem:[%s880_s3 + $0x60] sm:$0xff]  ;;  %v131_v10 = vld [vmem:[%s880_s3 + $0x58] sm:$0xff]  ;;  %s436_s25 = sshll.u32 %s579_s24, 4  ;;  %vm428_vm3 = vcmask 91136   ;;  %s437_s25 = int_to_ptr.vmem [resolvable:$true] %s436_s25 }
   0x9   :  { %515 = vmatmul.mubr.msk.f32.vlgmr.msra.gmra.mxu1 %vm45_vm1, %v33_v5  ;;  %517 = vmatprep.subr.mxu1 %v577_v1  ;;  %v130_v11 = vld [vmem:[%s880_s3 + $0x50] sm:$0xff]  ;;  %v129_v12 = vld [vmem:[%s880_s3 + $0x48] sm:$0xff]  ;;  %v128_v13 = vld [vmem:[%s880_s3 + $0x40] sm:$0xff]  ;;  %p560_p1 = scmp.lt.s32.totalorder %s437_s25, %s437_s25 }
   0xa   :  { %518 = vmatpush3.msra.mxu1 %v135_v6  ;;  %549 = vmatprep.mubr.msk.f32.mxu1 %vm578_vm0, %v577_v1  ;;  %v127_v14 = vld [vmem:[%s880_s3 + $0x38] sm:$0xff]  ;;  %v126_v15 = vld [vmem:[%s880_s3 + $0x30] sm:$0xff]  ;;  %v125_v16 = vld [vmem:[%s880_s3 + $0x28] sm:$0xff] }
   0xb   :  { %519 = vmatprep.subr.mxu1 %v577_v1  ;;  %v124_v17 = vld [vmem:[%s880_s3 + $0x20] sm:$0xff]  ;;  %v123_v18 = vld [vmem:[%s880_s3 + $0x18] sm:$0xff]  ;;  %v122_v19 = vld [vmem:[%s880_s3 + $0x10] sm:$0xff] }
   0xc   :  { %520 = vmatpush3.msra.mxu1 %v134_v7  ;;  %v121_v20 = vld [vmem:[%s880_s3 + $0x8] sm:$0xff]  ;;  %v120_v21 = vld [vmem:[%s880_s3] sm:$0xff]  ;;  %v229_v22 = vld [vmem:[%s882_s5 + $0x78] sm:$0xff] }
   0xd   :  { %521 = vmatprep.subr.mxu1 %v577_v1  ;;  %v228_v23 = vld [vmem:[%s882_s5 + $0x70] sm:$0xff]  ;;  %v227_v24 = vld [vmem:[%s882_s5 + $0x68] sm:$0xff]  ;;  %262 = vmatprep.subr.mxu0 %v229_v22  ;;  %v226_v25 = vld [vmem:[%s882_s5 + $0x60] sm:$0xff] }
   0xe   :  { %522 = vmatpush3.msra.mxu1 %v133_v8  ;;  %263 = vmatpush1.msra.mxu0 %v228_v23  ;;  %v225_v26 = vld [vmem:[%s882_s5 + $0x58] sm:$0xff]  ;;  %v224_v27 = vld [vmem:[%s882_s5 + $0x50] sm:$0xff]  ;;  %v223_v28 = vld [vmem:[%s882_s5 + $0x48] sm:$0xff] }
   0xf   :  { %523 = vmatprep.subr.mxu1 %v577_v1  ;;  %264 = vmatprep.subr.mxu0 %v227_v24  ;;  %v222_v29 = vld [vmem:[%s882_s5 + $0x40] sm:$0xff]  ;;  %v221_v30 = vld [vmem:[%s882_s5 + $0x38] sm:$0xff]  ;;  %v220_v31 = vld [vmem:[%s882_s5 + $0x30] sm:$0xff] }
  0x10   :  { %524 = vmatpush3.msra.mxu1 %v132_v9  ;;  %265 = vmatpush1.msra.mxu0 %v226_v25  ;;  %v219_v32 = vld [vmem:[%s882_s5 + $0x28] sm:$0xff]  ;;  %v444_v33 = vld [vmem:[%s879_s2] ss:$0 sm:$0xff]  ;;  %v217_v39 = vld [vmem:[%s882_s5 + $0x18] sm:$0xff] }
  0x11   :  { %525 = vmatprep.subr.mxu1 %v577_v1  ;;  %266 = vmatprep.subr.mxu0 %v225_v26  ;;  %v218_v38 = vld [vmem:[%s882_s5 + $0x20] sm:$0xff]  ;;  %v216_v40 = vld [vmem:[%s882_s5 + $0x10] sm:$0xff]  ;;  %v215_v41 = vld [vmem:[%s882_s5 + $0x8] sm:$0xff] }
  0x12   :  { %526 = vmatpush3.msra.mxu1 %v131_v10  ;;  %267 = vmatpush1.msra.mxu0 %v224_v27  ;;  %v214_v42 = vld [vmem:[%s882_s5] sm:$0xff]  ;;  %v350_v43 = vld [vmem:[%s884_s7 + $0xf8] sm:$0xff]  ;;  %v349_v50 = vld [vmem:[%s884_s7 + $0xf0] sm:$0xff] }
  0x13   :  { %527 = vmatprep.subr.mxu1 %v577_v1  ;;  %268 = vmatprep.subr.mxu0 %v223_v28  ;;  %v446_v44 = vld [vmem:[%s881_s4] ss:$0 sm:$0xff]  ;;  %v334_v49 = vld [vmem:[%s884_s7 + $0x78] sm:$0xff]  ;;  %v333_v51 = vld [vmem:[%s884_s7 + $0x70] sm:$0xff] }
  0x14   :  { %528 = vmatpush3.msra.mxu1 %v130_v11  ;;  %269 = vmatpush1.msra.mxu0 %v222_v29  ;;  %v348_v52 = vld [vmem:[%s884_s7 + $0xe8] sm:$0xff]  ;;  %v347_v54 = vld [vmem:[%s884_s7 + $0xe0] sm:$0xff]  ;;  %v346_v56 = vld [vmem:[%s884_s7 + $0xd8] sm:$0xff] }
  0x15   :  { %529 = vmatprep.subr.mxu1 %v577_v1  ;;  %270 = vmatprep.subr.mxu0 %v221_v30  ;;  %v332_v53 = vld [vmem:[%s884_s7 + $0x68] sm:$0xff]  ;;  %v331_v55 = vld [vmem:[%s884_s7 + $0x60] sm:$0xff]  ;;  %v330_v57 = vld [vmem:[%s884_s7 + $0x58] sm:$0xff] }
  0x16   :  { %530 = vmatpush3.msra.mxu1 %v129_v12  ;;  %271 = vmatpush1.msra.mxu0 %v220_v31  ;;  %v345_v58 = vld [vmem:[%s884_s7 + $0xd0] sm:$0xff]  ;;  %v344_v60 = vld [vmem:[%s884_s7 + $0xc8] sm:$0xff]  ;;  %v343_v62 = vld [vmem:[%s884_s7 + $0xc0] sm:$0xff] }
  0x17   :  { %531 = vmatprep.subr.mxu1 %v577_v1  ;;  %272 = vmatprep.subr.mxu0 %v219_v32  ;;  %v329_v59 = vld [vmem:[%s884_s7 + $0x50] sm:$0xff]  ;;  %v328_v61 = vld [vmem:[%s884_s7 + $0x48] sm:$0xff]  ;;  %v327_v63 = vld [vmem:[%s884_s7 + $0x40] sm:$0xff] }
  0x18   :  { %532 = vmatpush3.msra.mxu1 %v128_v13  ;;  %273 = vmatpush1.msra.mxu0 %v218_v38  ;;  %v342_v0 = vld [vmem:[%s884_s7 + $0xb8] sm:$0xff]  ;;  %v341_v2 = vld [vmem:[%s884_s7 + $0xb0] sm:$0xff]  ;;  %v340_v4 = vld [vmem:[%s884_s7 + $0xa8] sm:$0xff] }
  0x19   :  { %533 = vmatprep.subr.mxu1 %v577_v1  ;;  %274 = vmatprep.subr.mxu0 %v217_v39  ;;  %v325_v3 = vld [vmem:[%s884_s7 + $0x30] sm:$0xff]  ;;  %v324_v5 = vld [vmem:[%s884_s7 + $0x28] sm:$0xff]  ;;  %v339_v6 = vld [vmem:[%s884_s7 + $0xa0] sm:$0xff] }
  0x1a   :  { %534 = vmatpush3.msra.mxu1 %v127_v14  ;;  %275 = vmatpush1.msra.mxu0 %v216_v40  ;;  %v323_v7 = vld [vmem:[%s884_s7 + $0x20] sm:$0xff]  ;;  %v338_v8 = vld [vmem:[%s884_s7 + $0x98] sm:$0xff]  ;;  %v337_v10 = vld [vmem:[%s884_s7 + $0x90] sm:$0xff] }
  0x1b   :  { %535 = vmatprep.subr.mxu1 %v577_v1  ;;  %276 = vmatprep.subr.mxu0 %v215_v41  ;;  %v322_v9 = vld [vmem:[%s884_s7 + $0x18] sm:$0xff]  ;;  %v321_v11 = vld [vmem:[%s884_s7 + $0x10] sm:$0xff]  ;;  %v336_v12 = vld [vmem:[%s884_s7 + $0x88] sm:$0xff] }
  0x1c   :  { %536 = vmatpush3.msra.mxu1 %v126_v15  ;;  %277 = vmatpush1.msra.mxu0 %v214_v42  ;;  %v320_v13 = vld [vmem:[%s884_s7 + $0x8] sm:$0xff]  ;;  %v335_v14 = vld [vmem:[%s884_s7 + $0x80] sm:$0xff] }
  0x1d   :  { %537 = vmatprep.subr.mxu1 %v577_v1  ;;  %471 = vmatprep.subr.mxu0 %v350_v43  ;;  %v319_v15 = vld [vmem:[%s884_s7] sm:$0xff] }
  0x1e   :  { %538 = vmatpush3.msra.mxu1 %v125_v16  ;;  %v232_v16 = vlaneseq  ;;  %v448_v30 = vld [vmem:[%s885_s8] ss:$0 sm:$0xff] }
  0x1f   :  { %539 = vmatprep.subr.mxu1 %v577_v1 }
  0x20   :  { %540 = vmatpush3.msra.mxu1 %v124_v17  ;;  %v233_v17 = vshrl.u32 %v232_v16, 7 }
  0x21   :  { %541 = vmatprep.subr.mxu1 %v577_v1 }
  0x22   :  { %542 = vmatpush3.msra.mxu1 %v123_v18  ;;  %v234_v18 = vsub.s32 0, %v233_v17 }
  0x23   :  { %543 = vmatprep.subr.mxu1 %v577_v1 }
  0x24   :  { %544 = vmatpush3.msra.mxu1 %v122_v19  ;;  %v230_v19 = vld [vmem:[%s883_s6] sm:$0x3]  ;;  %s555_s6 = scalar_lea.vmem %s437_s25, 32 }
  0x25   :  { %545 = vmatprep.subr.mxu1 %v577_v1  ;;  %p556_p0 = scmp.ne.s32.totalorder %s437_s25, %s555_s6  ;;  %p561_p2 = scmp.lt.s32.totalorder %s555_s6, %s555_s6 }
  0x26   :  { %546 = vmatpush3.msra.mxu1 %v121_v20  ;;  %v238_v20 = vsub.s32 1, %v233_v17 }
  0x27   :  { %547 = vmatprep.subr.mxu1 %v577_v1  ;;  %v326_v1 = vld [vmem:[%s884_s7 + $0x38] sm:$0xff]  ;;  %p562_p3 = por %p561_p2, %p560_p1 }
  0x28   :  { %548 = vmatpush3.msra.mxu1 %v120_v21  ;;  %v235_v21 = vrot.slane %v230_v19, %v234_v18  ;;  %v239_v22 = vrot.slane %v230_v19, %v238_v20 }
  0x29   :  { %p563_p4 = pnand %p562_p3, %p556_p0 }
  0xc9   :  { %v115_v34 = vpop.f32.mrf.mxu1 }
  0xca   :  { %v116_v35 = vadd.f32 %v444_v33, %v115_v34 }
  0xcb   :  { %v516_v36 = vpop.f32.mrf.mxu1 }
  0xcc   :  { %v119_v37 = vmax.f32 %v116_v35, 0.0 }
  0xce   :  { %550 = vmatmul.mubr.f32.vlgmr.msra.gmra.mxu1 %v119_v37 }
 0x18e   :  { %v209_v45 = vpop.f32.mrf.mxu1 }
 0x18f   :  { %v210_v46 = vadd.f32 %v446_v44, %v209_v45 }
 0x190   :  { %v551_v47 = vpop.f32.mrf.mxu1 }
 0x191   :  { %v213_v48 = vmax.f32 %v210_v46, 0.0 }
 0x193   :  { %447 = vmatmul.mubr.msk.f32.vlgmr.msra.gmra.mxu0 %vm242_vm2, %v213_v48 }
 0x194   :  { %472 = vmatpush3.msra.mxu0 %v334_v49 }
 0x195   :  { %473 = vmatprep.subr.mxu0 %v349_v50 }
 0x196   :  { %474 = vmatpush3.msra.mxu0 %v333_v51 }
 0x197   :  { %475 = vmatprep.subr.mxu0 %v348_v52 }
 0x198   :  { %476 = vmatpush3.msra.mxu0 %v332_v53 }
 0x199   :  { %477 = vmatprep.subr.mxu0 %v347_v54 }
 0x19a   :  { %478 = vmatpush3.msra.mxu0 %v331_v55 }
 0x19b   :  { %479 = vmatprep.subr.mxu0 %v346_v56 }
 0x19c   :  { %480 = vmatpush3.msra.mxu0 %v330_v57 }
 0x19d   :  { %481 = vmatprep.subr.mxu0 %v345_v58 }
 0x19e   :  { %482 = vmatpush3.msra.mxu0 %v329_v59 }
 0x19f   :  { %483 = vmatprep.subr.mxu0 %v344_v60 }
 0x1a0   :  { %484 = vmatpush3.msra.mxu0 %v328_v61 }
 0x1a1   :  { %485 = vmatprep.subr.mxu0 %v343_v62 }
 0x1a2   :  { %486 = vmatpush3.msra.mxu0 %v327_v63 }
 0x1a3   :  { %487 = vmatprep.subr.mxu0 %v342_v0 }
 0x1a4   :  { %488 = vmatpush3.msra.mxu0 %v326_v1 }
 0x1a5   :  { %489 = vmatprep.subr.mxu0 %v341_v2 }
 0x1a6   :  { %490 = vmatpush3.msra.mxu0 %v325_v3 }
 0x1a7   :  { %491 = vmatprep.subr.mxu0 %v340_v4 }
 0x1a8   :  { %492 = vmatpush3.msra.mxu0 %v324_v5 }
 0x1a9   :  { %493 = vmatprep.subr.mxu0 %v339_v6 }
 0x1aa   :  { %494 = vmatpush3.msra.mxu0 %v323_v7 }
 0x1ab   :  { %495 = vmatprep.subr.mxu0 %v338_v8 }
 0x1ac   :  { %496 = vmatpush3.msra.mxu0 %v322_v9 }
 0x1ad   :  { %497 = vmatprep.subr.mxu0 %v337_v10 }
 0x1ae   :  { %498 = vmatpush3.msra.mxu0 %v321_v11 }
 0x1af   :  { %499 = vmatprep.subr.mxu0 %v336_v12 }
 0x1b0   :  { %500 = vmatpush3.msra.mxu0 %v320_v13 }
 0x1b1   :  { %501 = vmatprep.subr.mxu0 %v335_v14 }
 0x1b2   :  { %502 = vmatpush3.msra.mxu0 %v319_v15 }
 0x253   :  { %v312_v23 = vpop.f32.mrf.mxu0 }
 0x254   :  { %v313_v24 = vadd.f32 %v312_v23, %v235_v21 }
 0x255   :  { %v314_v25 = vpop.f32.mrf.mxu0 }
 0x256   :  { %v315_v26 = vadd.f32 %v314_v25, %v239_v22  ;;  %v317_v28 = vmax.f32 %v313_v24, 0.0 }
 0x258   :  { %v318_v27 = vmax.f32 %v315_v26, 0.0 }
 0x25a   :  { %422 = vmatprep.mubr.f32.mxu0 %v318_v27 }
 0x25b   :  { %423 = vmatmul.mubr.f32.vlgmr.msra.gmra.mxu0 %v317_v28 }
 0x31b   :  { %v503_v29 = vpop.f32.mrf.mxu0 }
 0x31d   :  { %v504_v31 = vpop.f32.mrf.mxu0 }
 0x31e   :  { %v505_v32 = vadd.f32 %v504_v31, %v503_v29 }
 0x320   :  { %v425_v33 = vadd.f32 %v505_v32, %v448_v30 }
 0x322   :  { %429 = vst.msk [vmem:[#allocation2] sm:$0x3] %vm428_vm3, %v425_v33 }
 0x323   :  { %566 = shalt.err (!%p563_p4)
}
 0x324   :  { %439 = dma.vmem_to_hbm [thread:$0]  %s437_s25, 32, %s886_s9, [#allocation3]  }
 0x325   :  { %575 = dma.done.wait [#allocation3], 32  }
 0x326   :  { %576 = vsyncadd [#allocation3], 4294967264 }
 0x327   :  { %443 = vsyncpa [#allocation3], 1 }

</bundles_post_ra>
